<compile_context>
chip_gen: v6e
topology: v6e:2x2x1
jax: 0.10.0
libtpu: 0.0.40
codegen_flags: <defaults>
</compile_context>

<pallas_src>
import functools

import jax
import jax.numpy as jnp
from jax.experimental import pallas as pl
from jax.experimental.pallas import tpu as pltpu

_NEG_BIG = -1e30  # bias for padded logit columns -> exp() underflows to exactly 0


def _ceil_to(x: int, m: int) -> int:
    return -(-x // m) * m


def mlp_kernel(x_ref, w1_ref, b1_ref, w2_ref, b2_ref, o_ref):
    # hidden layer: Linear -> Dropout(identity in eval) -> ReLU
    x = x_ref[...].astype(w1_ref.dtype)  # bf16 cast on the VPU, hidden under MXU work
    h = jnp.dot(x, w1_ref[...], preferred_element_type=jnp.float32) + b1_ref[...]
    h = jnp.maximum(h, 0.0)
    # clf: Linear (bf16 MXU feed, f32 accumulation)
    logits = jnp.dot(h.astype(w2_ref.dtype), w2_ref[...],
                     preferred_element_type=jnp.float32) + b2_ref[...]
    # softmax along dim=1; padded columns carry a -1e30 (f32) bias so exp == 0 there
    m = jnp.max(logits, axis=-1, keepdims=True)
    e = jnp.exp(logits - m)
    denom = jnp.sum(e, axis=-1, keepdims=True)
    # exact normalisation (rows must sum to 1); the approx EUP reciprocal is not
    # accurate enough for the softmax contract, so use a true f32 divide.
    o_ref[...] = (e / denom).astype(o_ref.dtype)


@functools.partial(jax.jit, static_argnames=("block_b", "matmul_dtype"))
def mlp_forward(x, w1, b1, w2, b2, *, block_b=256, matmul_dtype=jnp.bfloat16):
    """x: (B, in), w1: (in, hid), b1: (1, hid), w2: (hid, out), b2: (1, out)."""
    B, in_f = x.shape
    hid = w1.shape[1]
    out_f = w2.shape[1]

    # --- lane-dense hidden dim: zero-pad hid to a multiple of 128 (exact) ---------
    hid_p = _ceil_to(hid, 128)
    if hid_p != hid:
        w1 = jnp.pad(w1, ((0, 0), (0, hid_p - hid)))
        b1 = jnp.pad(b1, ((0, 0), (0, hid_p - hid)))
        w2 = jnp.pad(w2, ((0, hid_p - hid), (0, 0)))

    # --- lane-dense output: pad out_features to a multiple of 128, -1e30 bias -----
    out_p = _ceil_to(out_f, 128)
    if out_p != out_f:
        w2 = jnp.pad(w2, ((0, 0), (0, out_p - out_f)))
        b2 = jnp.pad(b2, ((0, 0), (0, out_p - out_f)), constant_values=_NEG_BIG)

    # --- batch tiling: multiple of 16 rows (bf16 sublane packing); prefer >=2 grid
    #     steps for big batches so the "parallel" axis can shard across TCs --------
    tb = min(block_b, _ceil_to(B, 16))
    if B >= 128 and B <= tb:          # single tile but splittable -> use two tiles
        tb = _ceil_to(-(-B // 2), 16)
    tb = _ceil_to(tb, 16)
    b_pad = (-B) % tb
    if b_pad:
        x = jnp.pad(x, ((0, b_pad), (0, 0)))
    Bp = B + b_pad

    # weights pre-cast to bf16 (small, one-time); x stays in native dtype and is
    # cast inside the kernel (saves a full wrapper-side HBM pass over x)
    w1_c = w1.astype(matmul_dtype)
    w2_c = w2.astype(matmul_dtype)
    b1_f = b1.astype(jnp.float32)
    b2_f = b2.astype(jnp.float32)

    # --- explicit VMEM budget: double-buffered tiles + weights + intermediates ----
    x_bytes = jnp.dtype(x.dtype).itemsize
    w_bytes = jnp.dtype(matmul_dtype).itemsize
    vmem_need = (
        2 * tb * in_f * x_bytes            # x tile (double buffered)
        + 2 * in_f * hid_p * w_bytes       # w1 (grid-invariant)
        + 2 * hid_p * 4                    # b1
        + 2 * hid_p * out_p * w_bytes      # w2 (grid-invariant)
        + 2 * out_p * 4                    # b2
        + 2 * tb * out_p * 4               # out tile (double buffered)
        + tb * hid_p * (4 + w_bytes)       # h (f32) + bf16 recast
        + 3 * tb * out_p * 4               # logits / exp / store staging
    )
    vmem_limit = int(min(max(vmem_need * 3 // 2, 4 << 20), 64 << 20))

    cost = pl.CostEstimate(
        flops=2 * Bp * (in_f * hid_p + hid_p * out_p),
        transcendentals=Bp * out_p,
        bytes_accessed=(Bp * in_f * x_bytes + in_f * hid_p * w_bytes
                        + hid_p * out_p * w_bytes + (hid_p + out_p) * 4
                        + Bp * out_p * 4),
    )

    out = pl.pallas_call(
        mlp_kernel,
        out_shape=jax.ShapeDtypeStruct((Bp, out_p), jnp.float32),
        grid_spec=pltpu.PrefetchScalarGridSpec(
            num_scalar_prefetch=0,
            grid=(Bp // tb,),
            in_specs=[
                pl.BlockSpec((tb, in_f), lambda i: (i, 0)),      # x: batch-tiled
                pl.BlockSpec((in_f, hid_p), lambda i: (0, 0)),   # w1: grid-invariant
                pl.BlockSpec((1, hid_p), lambda i: (0, 0)),      # b1: grid-invariant
                pl.BlockSpec((hid_p, out_p), lambda i: (0, 0)),  # w2: grid-invariant
                pl.BlockSpec((1, out_p), lambda i: (0, 0)),      # b2: grid-invariant
            ],
            out_specs=pl.BlockSpec((tb, out_p), lambda i: (i, 0)),
        ),
        compiler_params=pltpu.CompilerParams(
            dimension_semantics=("parallel",),   # batch tiles are independent
            vmem_limit_bytes=vmem_limit,
        ),
        cost_estimate=cost,
    )(x, w1_c, b1_f, w2_c, b2_f)

    # strip batch + lane padding outside the kernel
    return out[:B, :out_f]


def init_linear(key, fan_in, fan_out):
    # deterministic, roughly PyTorch's U(-1/sqrt(fan_in), 1/sqrt(fan_in))
    kw, kb = jax.random.split(key)
    bound = 1.0 / (fan_in ** 0.5)
    w = jax.random.uniform(kw, (fan_in, fan_out), jnp.float32, -bound, bound)
    b = jax.random.uniform(kb, (1, fan_out), jnp.float32, -bound, bound)
    return w, b


if __name__ == "__main__":
    # MLP(in_features=32, out_features=32, hidden_layer_features=(32,)), eval mode
    batch, in_features, hidden, out_features = 8, 32, 32, 32

    key = jax.random.PRNGKey(0)
    kx, k1, k2 = jax.random.split(key, 3)

    x = jax.random.normal(kx, (batch, in_features), jnp.float32)
    w1, b1 = init_linear(k1, in_features, hidden)      # layers[0]: Linear
    w2, b2 = init_linear(k2, hidden, out_features)     # clf: Linear

    out = mlp_forward(x, w1, b1, w2, b2)
    jax.block_until_ready(out)

    # sanity check against a pure-JAX reference with matching bf16 MXU inputs
    # (eval-mode dropout = identity); hid/out padding is numerically exact.
    xb, w1b, w2b = (a.astype(jnp.bfloat16) for a in (x, w1, w2))
    h_ref = jnp.maximum(
        jnp.dot(xb, w1b, preferred_element_type=jnp.float32) + b1, 0.0)
    logits_ref = jnp.dot(h_ref.astype(jnp.bfloat16), w2b,
                         preferred_element_type=jnp.float32) + b2
    ref = jax.nn.softmax(logits_ref, axis=1)

    assert out.shape == (batch, out_features)
    assert jnp.allclose(out, ref, atol=1e-3, rtol=1e-2)
    assert jnp.allclose(jnp.sum(out, axis=1), 1.0, atol=1e-3)

    # TODO(synk): training-mode dropout masking and the return_loss/criterion path
    # are not implemented (forward/eval semantics only).
    print("KERNEL_OK")
</pallas_src>

<mosaic_0001>
module attributes {stable_mosaic.version = 11 : i64} {
  func.func @mlp_kernel(%arg0: i32, %arg1: memref<16x32xf32, #tpu.memory_space<vmem>>, %arg2: memref<32x128xbf16, #tpu.memory_space<vmem>>, %arg3: memref<1x128xf32, #tpu.memory_space<vmem>>, %arg4: memref<128x128xbf16, #tpu.memory_space<vmem>>, %arg5: memref<1x128xf32, #tpu.memory_space<vmem>>, %arg6: memref<16x128xf32, #tpu.memory_space<vmem>>) attributes {dimension_semantics = [#tpu.dimension_semantics<parallel>], iteration_bounds = array<i64: 1>, scalar_prefetch = 0 : i64, scratch_operands = 0 : i64, tpu.core_type = #tpu.core_type<tc>, window_params = [{transform_indices = @transform_0, window_bounds = array<i64: 16, 32>}, {pipeline_mode = #tpu.pipeline_mode<synchronous>, transform_indices = @transform_1, window_bounds = array<i64: 32, 128>}, {pipeline_mode = #tpu.pipeline_mode<synchronous>, transform_indices = @transform_2, window_bounds = array<i64: 1, 128>}, {pipeline_mode = #tpu.pipeline_mode<synchronous>, transform_indices = @transform_3, window_bounds = array<i64: 128, 128>}, {pipeline_mode = #tpu.pipeline_mode<synchronous>, transform_indices = @transform_4, window_bounds = array<i64: 1, 128>}, {transform_indices = @transform_5, window_bounds = array<i64: 16, 128>}]} {
    %c0 = arith.constant 0 : index
    %c0_0 = arith.constant 0 : index
    %0 = vector.load %arg1[%c0, %c0_0] : memref<16x32xf32, #tpu.memory_space<vmem>>, vector<16x32xf32>
    %1 = arith.truncf %0 : vector<16x32xf32> to vector<16x32xbf16>
    %c0_1 = arith.constant 0 : index
    %c0_2 = arith.constant 0 : index
    %2 = vector.load %arg2[%c0_1, %c0_2] : memref<32x128xbf16, #tpu.memory_space<vmem>>, vector<32x128xbf16>
    %cst = arith.constant dense<0.000000e+00> : vector<16x128xf32>
    %3 = tpu.matmul %1, %2, %cst {dimension_numbers = #tpu.dot_dimension_numbers<[1], [0], [0], [1], [0, 0, 1, 1], [], []>} : vector<16x32xbf16>, vector<32x128xbf16>, vector<16x128xf32> -> vector<16x128xf32>
    %c0_3 = arith.constant 0 : index
    %c0_4 = arith.constant 0 : index
    %4 = vector.load %arg3[%c0_3, %c0_4] : memref<1x128xf32, #tpu.memory_space<vmem>>, vector<1x128xf32>
    %5 = vector.broadcast %4 : vector<1x128xf32> to vector<16x128xf32>
    %6 = arith.addf %3, %5 : vector<16x128xf32>
    %cst_5 = arith.constant 0.000000e+00 : f32
    %7 = vector.broadcast %cst_5 : f32 to vector<16x128xf32>
    %8 = arith.maximumf %6, %7 : vector<16x128xf32>
    %9 = arith.truncf %8 : vector<16x128xf32> to vector<16x128xbf16>
    %c0_6 = arith.constant 0 : index
    %c0_7 = arith.constant 0 : index
    %10 = vector.load %arg4[%c0_6, %c0_7] : memref<128x128xbf16, #tpu.memory_space<vmem>>, vector<128x128xbf16>
    %cst_8 = arith.constant dense<0.000000e+00> : vector<16x128xf32>
    %11 = tpu.matmul %9, %10, %cst_8 {dimension_numbers = #tpu.dot_dimension_numbers<[1], [0], [0], [1], [0, 0, 1, 1], [], []>} : vector<16x128xbf16>, vector<128x128xbf16>, vector<16x128xf32> -> vector<16x128xf32>
    %c0_9 = arith.constant 0 : index
    %c0_10 = arith.constant 0 : index
    %12 = vector.load %arg5[%c0_9, %c0_10] : memref<1x128xf32, #tpu.memory_space<vmem>>, vector<1x128xf32>
    %13 = vector.broadcast %12 : vector<1x128xf32> to vector<16x128xf32>
    %14 = arith.addf %11, %13 : vector<16x128xf32>
    %cst_11 = arith.constant dense<0xFF800000> : vector<16xf32>
    %15 = vector.multi_reduction <maximumf>, %14, %cst_11 [1] : vector<16x128xf32> to vector<16xf32>
    %16 = vector.shape_cast %15 : vector<16xf32> to vector<16x1xf32>
    %17 = vector.broadcast %16 : vector<16x1xf32> to vector<16x128xf32>
    %18 = arith.subf %14, %17 : vector<16x128xf32>
    %19 = math.exp %18 : vector<16x128xf32>
    %cst_12 = arith.constant dense<0.000000e+00> : vector<16xf32>
    %20 = vector.multi_reduction <add>, %19, %cst_12 [1] : vector<16x128xf32> to vector<16xf32>
    %21 = vector.shape_cast %20 : vector<16xf32> to vector<16x1xf32>
    %22 = vector.broadcast %21 : vector<16x1xf32> to vector<16x128xf32>
    %23 = arith.divf %19, %22 : vector<16x128xf32>
    %c0_13 = arith.constant 0 : index
    %c0_14 = arith.constant 0 : index
    %24 = vector.load %arg6[%c0_13, %c0_14] : memref<16x128xf32, #tpu.memory_space<vmem>>, vector<16x128xf32>
    tpu.vector_store %arg6[%c0_13, %c0_14], %23 {strides = array<i32>} : memref<16x128xf32, #tpu.memory_space<vmem>>, vector<16x128xf32>,
    return
  }
  func.func @transform_0(%arg0: i32) -> (i32, i32) {
    %c0_i32 = arith.constant 0 : i32
    %c0_i32_0 = arith.constant 0 : i32
    return %arg0, %c0_i32 : i32, i32
  }
  func.func @transform_1(%arg0: i32) -> (i32, i32) {
    %c0_i32 = arith.constant 0 : i32
    %c0_i32_0 = arith.constant 0 : i32
    %c0_i32_1 = arith.constant 0 : i32
    return %c0_i32, %c0_i32_0 : i32, i32
  }
  func.func @transform_2(%arg0: i32) -> (i32, i32) {
    %c0_i32 = arith.constant 0 : i32
    %c0_i32_0 = arith.constant 0 : i32
    %c0_i32_1 = arith.constant 0 : i32
    return %c0_i32, %c0_i32_0 : i32, i32
  }
  func.func @transform_3(%arg0: i32) -> (i32, i32) {
    %c0_i32 = arith.constant 0 : i32
    %c0_i32_0 = arith.constant 0 : i32
    %c0_i32_1 = arith.constant 0 : i32
    return %c0_i32, %c0_i32_0 : i32, i32
  }
  func.func @transform_4(%arg0: i32) -> (i32, i32) {
    %c0_i32 = arith.constant 0 : i32
    %c0_i32_0 = arith.constant 0 : i32
    %c0_i32_1 = arith.constant 0 : i32
    return %c0_i32, %c0_i32_0 : i32, i32
  }
  func.func @transform_5(%arg0: i32) -> (i32, i32) {
    %c0_i32 = arith.constant 0 : i32
    %c0_i32_0 = arith.constant 0 : i32
    return %arg0, %c0_i32 : i32, i32
  }
}

</mosaic_0001>

<bundles_post_ra>
// kernel: mlp_forward.1
= control target key start
LH: loop header
LB: loop body
LE: loop exit
PB: predicated region body
PF: predicated region fallthrough
CT: control target
= control target key end

     0   :  { %v304_v0 = vmov 0.0   ;;  %vm305_vm0 = vmmov 0   ;;  %vm47_vm1 = vcmask 261120   ;;  %s384_s1 = inlined_call_operand.vmem [shape: bf16[32,128], index: 1, kind: input, shape index: {}]   ;;  %s385_s0 = inlined_call_operand.vmem [shape: f32[16,32], index: 0, kind: input, shape index: {}]   ;;  %s386_s3 = inlined_call_operand.vmem [shape: bf16[128,128], index: 3, kind: input, shape index: {}]   ;;  %s387_s2 = inlined_call_operand.vmem [shape: f32[1,128], index: 2, kind: input, shape index: {}]   ;;  %s388_s4 = inlined_call_operand.vmem [shape: f32[1,128], index: 4, kind: input, shape index: {}]   ;;  %s389_s5 = inlined_call_operand.vmem [shape: f32[16,128], index: 5, kind: output, shape index: {}]  }
   0x1   :  { %256 = vmatprep.subr.bf16.mxu0 %v304_v0  ;;  %v286_v1 = vld [vmem:[%s384_s1 + $0x8] sm:$0xff]   ;;  %260 = vmatprep.mubr.msk.bf16.mxu0 %vm305_vm0, %v304_v0  ;;  %v287_v2 = vld [vmem:[%s384_s1] sm:$0xff]   ;;  %v288_v5 = vld [vmem:[%s386_s3 + $0x38] sm:$0xff]  }
   0x2   :  { %264 = vmatprep.subr.bf16.mxu1 %v304_v0  ;;  %280 = vmatprep.mubr.msk.bf16.mxu1 %vm305_vm0, %v304_v0  ;;  %v21_v3 = vld [vmem:[%s385_s0] sm:$0xff]  ;;  %v22_v4 = vld [vmem:[%s385_s0 + $0x8] sm:$0xff]  ;;  %v289_v7 = vld [vmem:[%s386_s3 + $0x30] sm:$0xff]  }
   0x3   :  { %257 = vmatpush3.bf16.msra.mxu0 %v286_v1  ;;  %v23_v6 = vpack.c.bf16 %v22_v4, %v21_v3  ;;  %265 = vmatpush3.bf16.msra.mxu1 %v288_v5  ;;  %v290_v8 = vld [vmem:[%s386_s3 + $0x28] sm:$0xff]   ;;  %v291_v9 = vld [vmem:[%s386_s3 + $0x20] sm:$0xff]   ;;  %v292_v10 = vld [vmem:[%s386_s3 + $0x18] sm:$0xff]  }
   0x4   :  { %258 = vmatprep.subr.bf16.mxu0 %v304_v0  ;;  %266 = vmatprep.subr.bf16.mxu1 %v304_v0  ;;  %v293_v11 = vld [vmem:[%s386_s3 + $0x10] sm:$0xff]   ;;  %v294_v12 = vld [vmem:[%s386_s3 + $0x8] sm:$0xff]   ;;  %v295_v13 = vld [vmem:[%s386_s3] sm:$0xff]  }
   0x5   :  { %v231_v14 = vld [vmem:[%s387_s2] ss:$0 sm:$0xff] }
   0x6   :  { %v235_v24 = vld [vmem:[%s388_s4] ss:$0 sm:$0xff] }
   0x7   :  { %259 = vmatpush3.bf16.msra.mxu0 %v287_v2  ;;  %267 = vmatpush3.bf16.msra.mxu1 %v289_v7 }
   0x8   :  { %268 = vmatprep.subr.bf16.mxu1 %v304_v0 }
   0xa   :  { %261 = vmatmul.mubr.msk.bf16.vlgmr.msra.gmra.mxu0 %vm47_vm1, %v23_v6 }
   0xb   :  { %269 = vmatpush3.bf16.msra.mxu1 %v290_v8 }
   0xc   :  { %270 = vmatprep.subr.bf16.mxu1 %v304_v0 }
   0xf   :  { %271 = vmatpush3.bf16.msra.mxu1 %v291_v9 }
  0x10   :  { %272 = vmatprep.subr.bf16.mxu1 %v304_v0 }
  0x13   :  { %273 = vmatpush3.bf16.msra.mxu1 %v292_v10 }
  0x14   :  { %274 = vmatprep.subr.bf16.mxu1 %v304_v0 }
  0x17   :  { %275 = vmatpush3.bf16.msra.mxu1 %v293_v11 }
  0x18   :  { %276 = vmatprep.subr.bf16.mxu1 %v304_v0 }
  0x1b   :  { %277 = vmatpush3.bf16.msra.mxu1 %v294_v12 }
  0x1c   :  { %278 = vmatprep.subr.bf16.mxu1 %v304_v0 }
  0x1f   :  { %279 = vmatpush3.bf16.msra.mxu1 %v295_v13 }
  0xca   :  { %v85_v15 = vpop.f32.mrf.mxu0 }
  0xcb   :  { %v86_v17 = vadd.f32 %v231_v14, %v85_v15 }
  0xcc   :  { %v262_v16 = vpop.f32.mrf.mxu0 }
  0xcd   :  { %v92_v21 = vmax.f32 %v86_v17, 0.0 }
  0xce   :  { %v88_v18 = vpop.f32.mrf.mxu0 }
  0xcf   :  { %v89_v19 = vadd.f32 %v231_v14, %v88_v18 }
  0xd0   :  { %v263_v20 = vpop.f32.mrf.mxu0 }
  0xd1   :  { %v93_v22 = vmax.f32 %v89_v19, 0.0 }
  0xd3   :  { %v94_v23 = vpack.c.bf16 %v93_v22, %v92_v21 }
  0xd5   :  { %281 = vmatmul.mubr.bf16.vlgmr.msra.gmra.mxu1 %v94_v23 }
 0x195   :  { %v200_v25 = vpop.f32.mrf.mxu1 }
 0x196   :  { %v201_v26 = vadd.f32 %v235_v24, %v200_v25 }
 0x197   :  { %v282_v27 = vpop.f32.mrf.mxu1 }
 0x198   :  { %207 = vmax.xlane.f32.xlu0 %v201_v26 }
 0x199   :  { %v203_v28 = vpop.f32.mrf.mxu1 }
 0x19a   :  { %v204_v29 = vadd.f32 %v235_v24, %v203_v28 }
 0x19b   :  { %v283_v30 = vpop.f32.mrf.mxu1 }
 0x19c   :  { %209 = vmax.xlane.f32.xlu0 %v204_v29 }
 0x221   :  { %v208_v31 = vpop.xlane.xlu0 %207 }
 0x222   :  { %v211_v32 = vsub.f32 %v201_v26, %v208_v31 }
 0x224   :  { %v213_v33 = vmul.f32 1.442695, %v211_v32 }
 0x225   :  { %v210_v34 = vpop.xlane.xlu0 %209 }
 0x226   :  { %296 = vpow2.f32 %v213_v33  ;;  %v212_v35 = vsub.f32 %v204_v29, %v210_v34 }
 0x228   :  { %v215_v36 = vmul.f32 1.442695, %v212_v35 }
 0x22a   :  { %298 = vpow2.f32 %v215_v36 }
 0x233   :  { %v297_v37 = vpop.eup %296 }
 0x234   :  { %217 = vadd.xlane.f32.xlu1 %v297_v37 }
 0x237   :  { %v299_v38 = vpop.eup %298 }
 0x238   :  { %219 = vadd.xlane.f32.xlu1 %v299_v38 }
 0x2bd   :  { %v218_v39 = vpop.xlane.xlu1 %217 }
 0x2be   :  { %300 = vrcp.f32 %v218_v39 }
 0x2c1   :  { %v220_v40 = vpop.xlane.xlu1 %219 }
 0x2c2   :  { %302 = vrcp.f32 %v220_v40 }
 0x2cb   :  { %v301_v41 = vpop.eup %300 }
 0x2cc   :  { %v222_v42 = vmul.f32 %v301_v41, %v297_v37 }
 0x2ce   :  { %225 = vst [vmem:[%s389_s5] sm:$0xff] %v222_v42 }
 0x2cf   :  { %v303_v43 = vpop.eup %302 }
 0x2d0   :  { %v224_v44 = vmul.f32 %v303_v43, %v299_v38 }
 0x2d2   :  { %226 = vst [vmem:[%s389_s5 + $0x8] sm:$0xff] %v224_v44 }

</bundles_post_ra>
